<compile_context>
chip_gen: v7x
topology: tpu7x:2x2x1
jax: 0.10.0
libtpu: 0.0.40
codegen_flags: <defaults>
</compile_context>

<pallas_src>
import math
from functools import partial

import jax
import jax.numpy as jnp
from jax.experimental import pallas as pl
from jax.experimental.pallas import tpu as pltpu


def mhsa_kernel(x_ref, w_qkv_ref, b_qkv_ref, o_ref, *, n_heads, d_head, nb, seq):
    D = n_heads * d_head
    R = nb * seq  # rows handled per grid step

    # Flatten (NB, S, D) -> (NB*S, D): one wide MXU pass for the fused QKV
    # projection.  bf16 operands, f32 accumulation.
    x = x_ref[...].reshape(R, D).astype(jnp.bfloat16)
    qkv = jnp.dot(x, w_qkv_ref[...], preferred_element_type=jnp.float32)
    qkv = qkv + b_qkv_ref[...]                              # (R, 3D), f32
    # Note: 1/sqrt(d_head) is already folded into the Q columns of w_qkv/b_qkv.

    def split_heads(t2d):
        # (R, D) f32 -> (H*NB, S, d_head) bf16; merged batch axis ordered
        # (head, batch).  Only rank-3 (1, 0, 2) transposes are used.
        t = jnp.transpose(t2d.reshape(R, n_heads, d_head), (1, 0, 2))  # (H, R, dh)
        return t.reshape(n_heads * nb, seq, d_head).astype(jnp.bfloat16)

    q = split_heads(qkv[:, 0:D])
    k = split_heads(qkv[:, D:2 * D])
    v = split_heads(qkv[:, 2 * D:3 * D])

    # Batched over (head, batch) on the MXU; contracts the last dims of both
    # operands directly (no explicit transpose of K).
    scores = jnp.einsum('bqd,bkd->bqk', q, k,
                        preferred_element_type=jnp.float32)  # (H*NB, S, S), f32

    # Numerically-stable softmax over keys; statistics in f32, reciprocal on
    # the EUP.
    scores = scores - jnp.max(scores, axis=-1, keepdims=True)
    probs = jnp.exp(scores)
    probs = probs * pl.reciprocal(jnp.sum(probs, axis=-1, keepdims=True),
                                  approx=True)

    out = jnp.einsum('bqk,bkd->bqd', probs.astype(jnp.bfloat16), v,
                     preferred_element_type=jnp.float32)     # (H*NB, S, dh), f32

    # Merge heads back and store the whole (NB, S, D) block once.
    out = jnp.transpose(out.reshape(n_heads, R, d_head), (1, 0, 2))  # (R, H, dh)
    o_ref[...] = out.reshape(nb, seq, D).astype(o_ref.dtype)


def _pick_batch_block(n, s, target_rows=128):
    """Largest divisor of n giving ~target_rows projection rows per grid step."""
    nb = max(1, min(n, target_rows // max(s, 1)))
    while n % nb:
        nb -= 1
    return nb


def mhsa_pallas(x, wq, bq, wk, bk, wv, bv, *, n_heads, batch_block=None):
    """x: (N, S, D); wq/wk/wv: (D, D) stored as (in, out); bq/bk/bv: (D,)."""
    N, S, D = x.shape
    assert D % n_heads == 0
    d_head = D // n_heads
    scale = 1.0 / math.sqrt(d_head)

    # Fuse Q/K/V params and fold the softmax scale into the Q projection
    # (one-time constant fold on weights; zero kernel cost).  Weight -> bf16
    # (MXU operand dtype, half the DMA bytes); bias stays f32.
    w_qkv = jnp.concatenate([wq * scale, wk, wv], axis=1).astype(jnp.bfloat16)
    b_qkv = jnp.concatenate([bq * scale, bk, bv]).reshape(1, 3 * D).astype(jnp.float32)

    nb = batch_block if batch_block is not None else _pick_batch_block(N, S)
    assert N % nb == 0, "batch block must divide N"

    kernel = partial(mhsa_kernel, n_heads=n_heads, d_head=d_head, nb=nb, seq=S)

    grid_spec = pltpu.PrefetchScalarGridSpec(
        num_scalar_prefetch=0,
        grid=(N // nb,),
        in_specs=[
            pl.BlockSpec((nb, S, D), lambda b: (b, 0, 0)),   # x
            pl.BlockSpec((D, 3 * D), lambda b: (0, 0)),      # fused W_qkv (bf16)
            pl.BlockSpec((1, 3 * D), lambda b: (0, 0)),      # fused b_qkv (f32)
        ],
        out_specs=pl.BlockSpec((nb, S, D), lambda b: (b, 0, 0)),
    )

    return pl.pallas_call(
        kernel,
        out_shape=jax.ShapeDtypeStruct((N, S, D), x.dtype),
        grid_spec=grid_spec,
        compiler_params=pltpu.CompilerParams(
            dimension_semantics=("parallel",),
            vmem_limit_bytes=32 * 1024 * 1024),
    )(x, w_qkv, b_qkv)


def mhsa_reference(x, wq, bq, wk, bk, wv, bv, *, n_heads):
    """Pure-JAX (f32) reference mirroring the PyTorch forward exactly."""
    N, S, D = x.shape
    d_head = D // n_heads
    q = (x @ wq + bq).reshape(N, S, n_heads, d_head).transpose(0, 2, 1, 3)
    k = (x @ wk + bk).reshape(N, S, n_heads, d_head).transpose(0, 2, 1, 3)
    v = (x @ wv + bv).reshape(N, S, n_heads, d_head).transpose(0, 2, 1, 3)
    scores = jnp.einsum('nhqd,nhkd->nhqk', q, k) / math.sqrt(d_head)
    probs = jax.nn.softmax(scores, axis=-1)
    out = jnp.einsum('nhqk,nhkd->nhqd', probs, v)
    return out.transpose(0, 2, 1, 3).reshape(N, S, D)


if __name__ == "__main__":
    # Small shapes consistent with the module: batch=2, seq=8, hidden_d=32, heads=2.
    N, S, D, H = 2, 8, 32, 2

    key = jax.random.PRNGKey(0)
    kx, kwq, kbq, kwk, kbk, kwv, kbv = jax.random.split(key, 7)

    x = jax.random.normal(kx, (N, S, D), dtype=jnp.float32)

    # Deterministic param init (Linear(hidden_d, hidden_d) with bias), stored
    # as (in, out) so the kernel computes x @ W + b.
    lim = 1.0 / math.sqrt(D)
    wq = jax.random.uniform(kwq, (D, D), jnp.float32, -lim, lim)
    bq = jax.random.uniform(kbq, (D,), jnp.float32, -lim, lim)
    wk = jax.random.uniform(kwk, (D, D), jnp.float32, -lim, lim)
    bk = jax.random.uniform(kbk, (D,), jnp.float32, -lim, lim)
    wv = jax.random.uniform(kwv, (D, D), jnp.float32, -lim, lim)
    bv = jax.random.uniform(kbv, (D,), jnp.float32, -lim, lim)

    out = mhsa_pallas(x, wq, bq, wk, bk, wv, bv, n_heads=H)
    out = jax.block_until_ready(out)

    ref = mhsa_reference(x, wq, bq, wk, bk, wv, bv, n_heads=H)
    assert out.shape == (N, S, D)
    # Tolerance accounts for bf16 MXU operands (f32 accumulation) and the EUP
    # approximate reciprocal in the softmax denominator.
    assert jnp.allclose(out, ref, atol=2e-2, rtol=2e-2), "mismatch vs reference"

    print("KERNEL_OK")
</pallas_src>

<mosaic_0001>
module attributes {stable_mosaic.version = 11 : i64} {
  func.func @mhsa_kernel(%arg0: i32, %arg1: memref<2x8x32xf32, #tpu.memory_space<vmem>>, %arg2: memref<32x96xbf16, #tpu.memory_space<vmem>>, %arg3: memref<1x96xf32, #tpu.memory_space<vmem>>, %arg4: memref<2x8x32xf32, #tpu.memory_space<vmem>>) attributes {dimension_semantics = [#tpu.dimension_semantics<parallel>], iteration_bounds = array<i64: 1>, scalar_prefetch = 0 : i64, scratch_operands = 0 : i64, tpu.core_type = #tpu.core_type<tc>, window_params = [{transform_indices = @transform_0, window_bounds = array<i64: 2, 8, 32>}, {pipeline_mode = #tpu.pipeline_mode<synchronous>, transform_indices = @transform_1, window_bounds = array<i64: 32, 96>}, {pipeline_mode = #tpu.pipeline_mode<synchronous>, transform_indices = @transform_2, window_bounds = array<i64: 1, 96>}, {transform_indices = @transform_3, window_bounds = array<i64: 2, 8, 32>}]} {
    %c0 = arith.constant 0 : index
    %c0_0 = arith.constant 0 : index
    %c0_1 = arith.constant 0 : index
    %0 = vector.load %arg1[%c0, %c0_0, %c0_1] : memref<2x8x32xf32, #tpu.memory_space<vmem>>, vector<2x8x32xf32>
    %1 = vector.shape_cast %0 : vector<2x8x32xf32> to vector<16x32xf32>
    %2 = arith.truncf %1 : vector<16x32xf32> to vector<16x32xbf16>
    %c0_2 = arith.constant 0 : index
    %c0_3 = arith.constant 0 : index
    %3 = vector.load %arg2[%c0_2, %c0_3] : memref<32x96xbf16, #tpu.memory_space<vmem>>, vector<32x96xbf16>
    %cst = arith.constant dense<0.000000e+00> : vector<16x96xf32>
    %4 = tpu.matmul %2, %3, %cst {dimension_numbers = #tpu.dot_dimension_numbers<[1], [0], [0], [1], [0, 0, 1, 1], [], []>} : vector<16x32xbf16>, vector<32x96xbf16>, vector<16x96xf32> -> vector<16x96xf32>
    %c0_4 = arith.constant 0 : index
    %c0_5 = arith.constant 0 : index
    %5 = vector.load %arg3[%c0_4, %c0_5] : memref<1x96xf32, #tpu.memory_space<vmem>>, vector<1x96xf32>
    %6 = vector.broadcast %5 : vector<1x96xf32> to vector<16x96xf32>
    %7 = arith.addf %4, %6 : vector<16x96xf32>
    %8 = vector.extract_strided_slice %7 {offsets = [0, 0], sizes = [16, 32], strides = [1, 1]} : vector<16x96xf32> to vector<16x32xf32>
    %9 = vector.shape_cast %8 : vector<16x32xf32> to vector<16x2x16xf32>
    %10 = tpu.transpose %9, [1, 0, 2] : vector<16x2x16xf32> -> vector<2x16x16xf32>
    %11 = vector.shape_cast %10 : vector<2x16x16xf32> to vector<4x8x16xf32>
    %12 = arith.truncf %11 : vector<4x8x16xf32> to vector<4x8x16xbf16>
    %13 = vector.extract_strided_slice %7 {offsets = [0, 32], sizes = [16, 32], strides = [1, 1]} : vector<16x96xf32> to vector<16x32xf32>
    %14 = vector.shape_cast %13 : vector<16x32xf32> to vector<16x2x16xf32>
    %15 = tpu.transpose %14, [1, 0, 2] : vector<16x2x16xf32> -> vector<2x16x16xf32>
    %16 = vector.shape_cast %15 : vector<2x16x16xf32> to vector<4x8x16xf32>
    %17 = arith.truncf %16 : vector<4x8x16xf32> to vector<4x8x16xbf16>
    %18 = vector.extract_strided_slice %7 {offsets = [0, 64], sizes = [16, 32], strides = [1, 1]} : vector<16x96xf32> to vector<16x32xf32>
    %19 = vector.shape_cast %18 : vector<16x32xf32> to vector<16x2x16xf32>
    %20 = tpu.transpose %19, [1, 0, 2] : vector<16x2x16xf32> -> vector<2x16x16xf32>
    %21 = vector.shape_cast %20 : vector<2x16x16xf32> to vector<4x8x16xf32>
    %22 = arith.truncf %21 : vector<4x8x16xf32> to vector<4x8x16xbf16>
    "tpu.trace_start"() <{level = 10 : i32, message = "bqd,bkd->bqk"}> : () -> ()
    %cst_6 = arith.constant dense<0.000000e+00> : vector<4x8x8xf32>
    %23 = tpu.matmul %12, %17, %cst_6 {dimension_numbers = #tpu.dot_dimension_numbers<[2], [2], [1], [1], [0, 0, 0, 1, 1, 1], [0], [0]>} : vector<4x8x16xbf16>, vector<4x8x16xbf16>, vector<4x8x8xf32> -> vector<4x8x8xf32>
    "tpu.trace_stop"() : () -> ()
    %cst_7 = arith.constant dense<0xFF800000> : vector<4x8xf32>
    %24 = vector.multi_reduction <maximumf>, %23, %cst_7 [2] : vector<4x8x8xf32> to vector<4x8xf32>
    %25 = vector.shape_cast %24 : vector<4x8xf32> to vector<4x8x1xf32>
    %26 = vector.broadcast %25 : vector<4x8x1xf32> to vector<4x8x8xf32>
    %27 = arith.subf %23, %26 : vector<4x8x8xf32>
    %28 = math.exp %27 : vector<4x8x8xf32>
    %cst_8 = arith.constant dense<0.000000e+00> : vector<4x8xf32>
    %29 = vector.multi_reduction <add>, %28, %cst_8 [2] : vector<4x8x8xf32> to vector<4x8xf32>
    %30 = vector.shape_cast %29 : vector<4x8xf32> to vector<4x8x1xf32>
    %31 = tpu.reciprocal %30 {approx = true} : vector<4x8x1xf32> -> vector<4x8x1xf32>
    %32 = vector.broadcast %31 : vector<4x8x1xf32> to vector<4x8x8xf32>
    %33 = arith.mulf %28, %32 : vector<4x8x8xf32>
    %34 = arith.truncf %33 : vector<4x8x8xf32> to vector<4x8x8xbf16>
    "tpu.trace_start"() <{level = 10 : i32, message = "bqk,bkd->bqd"}> : () -> ()
    %cst_9 = arith.constant dense<0.000000e+00> : vector<4x8x16xf32>
    %35 = tpu.matmul %34, %22, %cst_9 {dimension_numbers = #tpu.dot_dimension_numbers<[2], [1], [1], [2], [0, 0, 0, 1, 1, 2], [0], [0]>} : vector<4x8x8xbf16>, vector<4x8x16xbf16>, vector<4x8x16xf32> -> vector<4x8x16xf32>
    "tpu.trace_stop"() : () -> ()
    %36 = vector.shape_cast %35 : vector<4x8x16xf32> to vector<2x16x16xf32>
    %37 = tpu.transpose %36, [1, 0, 2] : vector<2x16x16xf32> -> vector<16x2x16xf32>
    %38 = vector.shape_cast %37 : vector<16x2x16xf32> to vector<2x8x32xf32>
    %c0_10 = arith.constant 0 : index
    %c0_11 = arith.constant 0 : index
    %c0_12 = arith.constant 0 : index
    %39 = vector.load %arg4[%c0_10, %c0_11, %c0_12] : memref<2x8x32xf32, #tpu.memory_space<vmem>>, vector<2x8x32xf32>
    tpu.vector_store %arg4[%c0_10, %c0_11, %c0_12], %38 {strides = array<i32>} : memref<2x8x32xf32, #tpu.memory_space<vmem>>, vector<2x8x32xf32>,
    return
  }
  func.func @transform_0(%arg0: i32) -> (i32, i32, i32) {
    %c0_i32 = arith.constant 0 : i32
    %c0_i32_0 = arith.constant 0 : i32
    %c0_i32_1 = arith.constant 0 : i32
    return %arg0, %c0_i32, %c0_i32_0 : i32, i32, i32
  }
  func.func @transform_1(%arg0: i32) -> (i32, i32) {
    %c0_i32 = arith.constant 0 : i32
    %c0_i32_0 = arith.constant 0 : i32
    %c0_i32_1 = arith.constant 0 : i32
    return %c0_i32, %c0_i32_0 : i32, i32
  }
  func.func @transform_2(%arg0: i32) -> (i32, i32) {
    %c0_i32 = arith.constant 0 : i32
    %c0_i32_0 = arith.constant 0 : i32
    %c0_i32_1 = arith.constant 0 : i32
    return %c0_i32, %c0_i32_0 : i32, i32
  }
  func.func @transform_3(%arg0: i32) -> (i32, i32, i32) {
    %c0_i32 = arith.constant 0 : i32
    %c0_i32_0 = arith.constant 0 : i32
    %c0_i32_1 = arith.constant 0 : i32
    return %arg0, %c0_i32, %c0_i32_0 : i32, i32, i32
  }
}

</mosaic_0001>

<bundles_post_ra>
// kernel: tpu_custom_call.1
= control target key start
LH: loop header
LB: loop body
LE: loop exit
PB: predicated region body
PF: predicated region fallthrough
CT: control target
= control target key end

     0   :  { %8 = vsyncpa [#allocation3], 0  ;;  %s2070_s0 = inlined_call_operand.hbm [shape: f32[2,8,32], index: 0, kind: input, shape index: {}]   ;;  %s2071_s1 = inlined_call_operand.hbm [shape: bf16[32,96], index: 1, kind: input, shape index: {}]   ;;  %s2072_s2 = inlined_call_operand.vmem [shape: f32[1,96], index: 2, kind: input, shape index: {}]   ;;  %s2073_s3 = inlined_call_operand.hbm [shape: f32[2,8,32], index: 3, kind: output, shape index: {}]  }
   0x1   :  { %9 = vsyncpa [#allocation6], 0 }
   0x2   :  { %10 = vsyncpa [#allocation4], 0  ;;  %s1743_s12 = smov [#allocation2]   ;;  %s1671_s16 = scalar_lea.hbm %s2070_s0, 256 }
   0x3   :  { %s16_s13 = sshll.u32 %s1743_s12, 4  ;;  %p1672_p0 = scmp.ne.s32.totalorder %s2070_s0, %s1671_s16  ;;  %s17_s13 = int_to_ptr.vmem [resolvable:$true] %s16_s13 }
   0x4   :  { %p1675_p1 = scmp.lt.u32.totalorder %s1671_s16, %s2070_s0 }
   0x6   :  { %p1677_p2 = pnand %p1675_p1, %p1672_p0 }
   0x8   :  { %1680 = shalt.err (!%p1677_p2)
}
   0x9   :  { %s1681_s21 = scalar_lea.vmem %s17_s13, 256  ;;  %p1686_p4 = scmp.lt.s32.totalorder %s17_s13, %s17_s13 }
   0xa   :  { %p1682_p3 = scmp.ne.s32.totalorder %s17_s13, %s1681_s21  ;;  %p1687_p5 = scmp.lt.s32.totalorder %s1681_s21, %s1681_s21 }
   0xc   :  { %p1688_p6 = por %p1687_p5, %p1686_p4 }
   0xe   :  { %p1689_p7 = pnand %p1688_p6, %p1682_p3 }
  0x10   :  { %1692 = shalt.err (!%p1689_p7)
}
  0x11   :  { %s1744_s22 = smov 128   ;;  %s1745_s23 = smov 8  }
  0x12   :  { %22 = dma.hbm_to_vmem [thread:$0]  %s2070_s0, 256, %s17_s13, [#allocation3], %s1744_s22, %s1744_s22, %s1745_s23  }
  0x13   :  { %s1746_s26 = smov [#allocation5]   ;;  %s1693_s30 = scalar_lea.hbm %s2071_s1, 256 }
  0x14   :  { %s28_s27 = sshll.u32 %s1746_s26, 4  ;;  %p1694_p8 = scmp.ne.s32.totalorder %s2071_s1, %s1693_s30  ;;  %s29_s27 = int_to_ptr.vmem [resolvable:$true] %s28_s27 }
  0x15   :  { %p1697_p9 = scmp.lt.u32.totalorder %s1693_s30, %s2071_s1 }
  0x17   :  { %p1699_p10 = pnand %p1697_p9, %p1694_p8 }
  0x19   :  { %1702 = shalt.err (!%p1699_p10)
}
  0x1a   :  { %s1703_s8 = scalar_lea.vmem %s29_s27, 256  ;;  %p1708_p12 = scmp.lt.s32.totalorder %s29_s27, %s29_s27 }
  0x1b   :  { %p1704_p11 = scmp.ne.s32.totalorder %s29_s27, %s1703_s8  ;;  %p1709_p13 = scmp.lt.s32.totalorder %s1703_s8, %s1703_s8 }
  0x1d   :  { %p1710_p0 = por %p1709_p13, %p1708_p12 }
  0x1f   :  { %p1711_p1 = pnand %p1710_p0, %p1704_p11 }
  0x21   :  { %1714 = shalt.err (!%p1711_p1)
}
  0x22   :  { %s1747_s0 = smov 64   ;;  %s1748_s9 = smov 4  }
  0x23   :  { %34 = dma.hbm_to_vmem [thread:$0]  %s2071_s1, 256, %s29_s27, [#allocation6], %s1747_s0, %s1747_s0, %s1748_s9  }
  0x24   :  { %1737 = dma.done.wait [#allocation3], 256  }
  0x25   :  { %1738 = vsyncadd [#allocation3], 4294967040 }
  0x26   :  { %1739 = dma.done.wait [#allocation6], 256  }
  0x27   :  { %1740 = vsyncadd [#allocation6], 4294967040  ;;  %v1749_v0 = vmov 0.0   ;;  %vm1750_vm0 = vmmov 0   ;;  %v1653_v1 = vld [vmem:[#allocation5] sm:$0xff]   ;;  %v1654_v2 = vld [vmem:[#allocation5 + $0x8] sm:$0xff]   ;;  %v127_v17 = vlaneseq }
  0x28   :  { %1583 = vmatprep.subr.bf16.mxu0 %v1749_v0  ;;  %1587 = vmatprep.mubr.msk.bf16.mxu0 %vm1750_vm0, %v1749_v0  ;;  %v44_v3 = vld [vmem:[#allocation2] sm:$0xff]  ;;  %v45_v4 = vld [vmem:[#allocation2 + $0x8] sm:$0xff]  ;;  %vm70_vm1 = vcmask 261120   ;;  %s1751_s13 = smov 96   ;;  %s1752_s14 = smov 112   ;;  %vm855_vm2 = vcmask 130048  }
  0x29   :  { %1591 = vmatprep.subr.bf16.mxu1 %v1749_v0  ;;  %1593 = vmatprep.mubr.msk.bf16.mxu1 %vm1750_vm0, %v1749_v0  ;;  %v46_v5 = vpack.c.bf16 %v45_v4, %v44_v3  ;;  %v1536_v6 = vld [vmem:[%s2072_s2] ss:$0 sm:$0xff]  ;;  %v1753_v15 = vmov 1983009808   ;;  %v128_v19 = vshrl.u32 %v127_v17, 7  ;;  %vm1040_vm3 = vcmask 64512  }
  0x2a   :  { %1584 = vmatpush3.bf16.msra.mxu0 %v1653_v1  ;;  %v125_v16 = vunpack.c.l.s4 %v1753_v15  ;;  %v1754_v20 = vmov 1934713408   ;;  %vm1092_vm4 = vcmask 1043456   ;;  %s1755_s2 = smov 16   ;;  %s1756_s15 = smov [#allocation7]  }
  0x2b   :  { %1585 = vmatprep.subr.bf16.mxu0 %v1749_v0  ;;  %v156_v21 = vunpack.c.l.s4 %v1754_v20  ;;  %s1523_s16 = sshll.u32 %s1756_s15, 4  ;;  %s1524_s16 = int_to_ptr.vmem [resolvable:$true] %s1523_s16 }
  0x2c   :  { %v126_v18 = vunpack.c.0.s8 %v125_v16  ;;  %s1715_s17 = scalar_lea.vmem %s1524_s16, 256  ;;  %p1720_p3 = scmp.lt.s32.totalorder %s1524_s16, %s1524_s16 }
  0x2d   :  { %v157_v24 = vunpack.c.0.s8 %v156_v21  ;;  %p1716_p2 = scmp.ne.s32.totalorder %s1524_s16, %s1715_s17  ;;  %p1721_p4 = scmp.lt.s32.totalorder %s1715_s17, %s1715_s17 }
  0x2e   :  { %1586 = vmatpush3.bf16.msra.mxu0 %v1654_v2  ;;  %v1834_v22 = vsub.s32 %v126_v18, %v128_v19 }
  0x2f   :  { %1597 = vmatprep.subr.bf16.mxu0 %v1749_v0  ;;  %v1845_v30 = vsub.s32 %v157_v24, %v128_v19  ;;  %p1722_p5 = por %p1721_p4, %p1720_p3 }
  0x31   :  { %1588 = vmatmul.mubr.msk.bf16.vlgmr.msra.gmra.mrb[0].mxu0 %vm70_vm1, %v46_v5  ;;  %p1723_p6 = pnand %p1722_p5, %p1716_p2 }
  0x32   :  { %1599 = vmatprep.mubr.msk.bf16.mxu0 %vm1750_vm0, %v1749_v0 }
 0x104   :  { %v108_v7 = vpop.f32.mrb[0].mxu0 }
 0x105   :  { %v1820_v8 = vadd.f32 %v1536_v6, %v108_v7  ;;  %v1589_v9 = vpop.f32.mrb[1].mxu0 }
 0x106   :  { %v111_v10 = vpop.f32.mrb[2].mxu0 }
 0x107   :  { %359 = vrot.lane.b32.xlu1 %v1820_v8, %s1751_s13  ;;  %117 = vrot.lane.b32.xlu0 %v1820_v8, %s1752_s14  ;;  %v1590_v11 = vpop.f32.mrb[3].mxu0  ;;  %v1824_v12 = vadd.f32 %v1536_v6, %v111_v10  ;;  %v123_v26 = vcombine.high %v1820_v8, %v1749_v0  ;;  %v130_v28 = vrot.slane %v1820_v8, %v1834_v22 }
 0x109   :  { %v137_v33 = vrot.slane %v123_v26, %v1834_v22  ;;  %v189_v35 = vcombine.high %v1824_v12, %v1749_v0  ;;  %v196_v44 = vrot.slane %v1824_v12, %v1834_v22 }
 0x10b   :  { %361 = vrot.lane.b32.xlu1 %v1824_v12, %s1751_s13  ;;  %119 = vrot.lane.b32.xlu0 %v1824_v12, %s1752_s14  ;;  %v203_v48 = vrot.slane %v189_v35, %v1834_v22 }
 0x179   :  { %v1828_v13 = vpop.permute.xlu0 %117  ;;  %v360_v27 = vpop.permute.xlu1 %359 }
 0x17a   :  { %363 = vrot.lane.b32.xlu0 %v1828_v13, %s1751_s13  ;;  %v138_v23 = vcombine.high %v1828_v13, %v1749_v0  ;;  %v145_v25 = vrot.slane %v1828_v13, %v1834_v22  ;;  %v371_v43 = vcombine.high %v360_v27, %v1749_v0  ;;  %v378_v49 = vrot.slane %v360_v27, %v1834_v22 }
 0x17c   :  { %v152_v29 = vrot.slane %v138_v23, %v1834_v22  ;;  %v153_v31 = vcombine.low %v130_v28, %v145_v25  ;;  %v154_v32 = vcombine.high %v130_v28, %v145_v25  ;;  %v385_v56 = vrot.slane %v371_v43, %v1834_v22 }
 0x17d   :  { %v1831_v14 = vpop.permute.xlu0 %119  ;;  %v362_v40 = vpop.permute.xlu1 %361 }
 0x17e   :  { %365 = vrot.lane.b32.xlu1 %v1831_v14, %s1751_s13  ;;  %v204_v34 = vcombine.high %v1831_v14, %v1749_v0  ;;  %v169_v36 = vcombine.low %v137_v33, %v152_v29  ;;  %v170_v37 = vcombine.high %v137_v33, %v152_v29  ;;  %v1853_v38 = vrot.slane %v153_v31, %v1845_v30 }
 0x17f   :  { %v1856_v39 = vrot.slane %v154_v32, %v1845_v30  ;;  %v211_v41 = vrot.slane %v1831_v14, %v1834_v22  ;;  %v437_v47 = vcombine.high %v362_v40, %v1749_v0  ;;  %v444_v57 = vrot.slane %v362_v40, %v1834_v22 }
 0x180   :  { %v218_v42 = vrot.slane %v204_v34, %v1834_v22  ;;  %v177_v45 = vrot.slane %v169_v36, %v1845_v30  ;;  %v184_v46 = vrot.slane %v170_v37, %v1845_v30 }
 0x181   :  { %v255_v50 = vcombine.low %v1853_v38, %v1856_v39  ;;  %v219_v51 = vcombine.low %v196_v44, %v211_v41  ;;  %v220_v52 = vcombine.high %v196_v44, %v211_v41  ;;  %v1540_v60 = vcombine.high %v1853_v38, %v1856_v39 }
 0x182   :  { %v235_v53 = vcombine.low %v203_v48, %v218_v42  ;;  %v236_v54 = vcombine.high %v203_v48, %v218_v42  ;;  %v271_v61 = vcombine.low %v177_v45, %v184_v46  ;;  %v1541_v62 = vcombine.high %v177_v45, %v184_v46 }
 0x183   :  { %v451_v63 = vrot.slane %v437_v47, %v1834_v22  ;;  %v1879_v1 = vrot.slane %v255_v50, %v1834_v22  ;;  %v227_v5 = vrot.slane %v219_v51, %v1845_v30  ;;  %v234_v6 = vrot.slane %v220_v52, %v1845_v30 }
 0x184   :  { %v243_v7 = vrot.slane %v235_v53, %v1845_v30  ;;  %v250_v9 = vrot.slane %v236_v54, %v1845_v30  ;;  %v278_v20 = vrot.slane %v271_v61, %v1834_v22  ;;  %v286_v21 = vrot.slane %v1541_v62, %v1834_v22 }
 0x185   :  { %v270_v48 = vrot.slane %v1540_v60, %v1834_v22  ;;  %v1542_v50 = vcombine.high %v227_v5, %v234_v6 }
 0x186   :  { %v321_v27 = vcombine.low %v243_v7, %v250_v9  ;;  %v1543_v40 = vcombine.high %v243_v7, %v250_v9 }
 0x188   :  { %v336_v61 = vrot.slane %v1543_v40, %v1834_v22 }
 0x1ec   :  { %v364_v55 = vpop.permute.xlu0 %363 }
 0x1ed   :  { %v386_v58 = vcombine.high %v364_v55, %v1749_v0  ;;  %v393_v59 = vrot.slane %v364_v55, %v1834_v22 }
 0x1ef   :  { %v400_v2 = vrot.slane %v386_v58, %v1834_v22  ;;  %v401_v3 = vcombine.low %v378_v49, %v393_v59  ;;  %v402_v4 = vcombine.high %v378_v49, %v393_v59  ;;  %v305_v49 = vcombine.low %v227_v5, %v234_v6 }
 0x1f0   :  { %v366_v10 = vpop.permute.xlu1 %365  ;;  %v295_v59 = vcombine.low %v278_v20, %v286_v21  ;;  %v320_v5 = vrot.slane %v1542_v50, %v1834_v22 }
 0x1f1   :  { %v409_v11 = vrot.slane %v401_v3, %v1845_v30  ;;  %v416_v15 = vrot.slane %v402_v4, %v1845_v30  ;;  %v417_v16 = vcombine.low %v385_v56, %v400_v2  ;;  %v418_v17 = vcombine.high %v385_v56, %v400_v2 }
 0x1f2   :  { %v452_v18 = vcombine.high %v366_v10, %v1749_v0  ;;  %v459_v19 = vrot.slane %v366_v10, %v1834_v22  ;;  %v328_v56 = vrot.slane %v321_v27, %v1834_v22  ;;  %v287_v3 = vcombine.low %v1879_v1, %v270_v48 }
 0x1f3   :  { %v425_v23 = vrot.slane %v417_v16, %v1845_v30  ;;  %v432_v24 = vrot.slane %v418_v17, %v1845_v30  ;;  %v503_v25 = vcombine.low %v409_v11, %v416_v15  ;;  %v1544_v26 = vcombine.high %v409_v11, %v416_v15 }
 0x1f4   :  { %v466_v28 = vrot.slane %v452_v18, %v1834_v22  ;;  %v467_v29 = vcombine.low %v444_v57, %v459_v19  ;;  %v468_v31 = vcombine.high %v444_v57, %v459_v19  ;;  %v312_v4 = vrot.slane %v305_v49, %v1834_v22 }
 0x1f5   :  { %v519_v32 = vcombine.low %v425_v23, %v432_v24  ;;  %v1545_v33 = vcombine.high %v425_v23, %v432_v24  ;;  %v510_v34 = vrot.slane %v503_v25, %v1834_v22  ;;  %v518_v35 = vrot.slane %v1544_v26, %v1834_v22 }
 0x1f6   :  { %v475_v36 = vrot.slane %v467_v29, %v1845_v30  ;;  %v482_v37 = vrot.slane %v468_v31, %v1845_v30  ;;  %v483_v38 = vcombine.low %v451_v63, %v466_v28  ;;  %v484_v39 = vcombine.high %v451_v63, %v466_v28 }
 0x1f7   :  { %v526_v41 = vrot.slane %v519_v32, %v1834_v22  ;;  %v534_v42 = vrot.slane %v1545_v33, %v1834_v22  ;;  %v535_v43 = vcombine.low %v510_v34, %v518_v35  ;;  %v302_v9 = vrot.slane %v295_v59, %v1845_v30 }
 0x1f8   :  { %v491_v44 = vrot.slane %v483_v38, %v1845_v30  ;;  %v498_v45 = vrot.slane %v484_v39, %v1845_v30  ;;  %v553_v46 = vcombine.low %v475_v36, %v482_v37  ;;  %v1546_v47 = vcombine.high %v475_v36, %v482_v37 }
 0x1f9   :  { %v543_v51 = vcombine.low %v526_v41, %v534_v42  ;;  %v542_v57 = vrot.slane %v535_v43, %v1845_v30  ;;  %v345_v15 = vcombine.low %v328_v56, %v336_v61  ;;  %v294_v17 = vrot.slane %v287_v3, %v1845_v30 }
 0x1fa   :  { %v560_v52 = vrot.slane %v553_v46, %v1834_v22  ;;  %v568_v53 = vrot.slane %v1546_v47, %v1834_v22  ;;  %v569_v54 = vcombine.low %v491_v44, %v498_v45  ;;  %v1547_v55 = vcombine.high %v491_v44, %v498_v45 }
 0x1fb   :  { %v550_v58 = vrot.slane %v543_v51, %v1845_v30  ;;  %v337_v1 = vcombine.low %v312_v4, %v320_v5  ;;  %v303_v20 = vcombine.low %v294_v17, %v302_v9  ;;  %v352_v23 = vrot.slane %v345_v15, %v1845_v30 }
 0x1fc   :  { %v576_v60 = vrot.slane %v569_v54, %v1834_v22  ;;  %v584_v62 = vrot.slane %v1547_v55, %v1834_v22  ;;  %v585_v63 = vcombine.low %v560_v52, %v568_v53  ;;  %v304_v33 = vcombine.high %v294_v17, %v302_v9 }
 0x1fd   :  { %v551_v2 = vcombine.low %v542_v57, %v550_v58  ;;  %v552_v18 = vcombine.high %v542_v57, %v550_v58  ;;  %v344_v26 = vrot.slane %v337_v1, %v1845_v30  ;;  %v355_v28 = vpack.c.bf16 %v303_v20, %v303_v20 }
 0x1fe   :  { %v593_v6 = vcombine.low %v576_v60, %v584_v62  ;;  %v592_v10 = vrot.slane %v585_v63, %v1845_v30  ;;  %v357_v36 = vpack.c.bf16 %v304_v33, %v304_v33 }
 0x1ff   :  { %v603_v7 = vpack.c.bf16 %v551_v2, %v551_v2  ;;  %v605_v24 = vpack.c.bf16 %v552_v18, %v552_v18  ;;  %v353_v29 = vcombine.low %v344_v26, %v352_v23  ;;  %v354_v37 = vcombine.high %v344_v26, %v352_v23 }
 0x200   :  { %v600_v11 = vrot.slane %v593_v6, %v1845_v30 }
 0x201   :  { %v860_v16 = vsel %vm855_vm2, %v603_v7, 0  ;;  %v952_v31 = vsel %vm855_vm2, %v605_v24, 0  ;;  %v356_v34 = vpack.c.bf16 %v353_v29, %v353_v29  ;;  %v358_v38 = vpack.c.bf16 %v354_v37, %v354_v37 }
 0x202   :  { %1592 = vmatpush3.bf16.xpose.msra.mxu1 %v860_v16  ;;  %v601_v19 = vcombine.low %v592_v10, %v600_v11  ;;  %v602_v27 = vcombine.high %v592_v10, %v600_v11 }
 0x203   :  { %1603 = vmatprep.subr.bf16.mxu1 %v1749_v0 }
 0x204   :  { %v604_v21 = vpack.c.bf16 %v601_v19, %v601_v19  ;;  %v606_v32 = vpack.c.bf16 %v602_v27, %v602_v27 }
 0x206   :  { %v906_v25 = vsel %vm855_vm2, %v604_v21, 0  ;;  %v998_v35 = vsel %vm855_vm2, %v606_v32, 0 }
 0x207   :  { %1598 = vmatpush3.bf16.xpose.msra.mxu0 %v906_v25 }
 0x208   :  { %1609 = vmatprep.subr.bf16.mxu0 %v1749_v0 }
 0x209   :  { %1594 = vmatmul.mubr.msk.bf16.vlgmr.msra.gmra.mrb[0].mxu1 %vm855_vm2, %v355_v28 }
 0x20a   :  { %1604 = vmatpush3.bf16.xpose.msra.mxu1 %v952_v31  ;;  %1605 = vmatprep.mubr.msk.bf16.mxu1 %vm1750_vm0, %v1749_v0 }
 0x20b   :  { %1615 = vmatprep.subr.bf16.mxu1 %v1749_v0 }
 0x20e   :  { %1600 = vmatmul.mubr.msk.bf16.vlgmr.msra.gmra.mrb[4].mxu0 %vm855_vm2, %v356_v34 }
 0x20f   :  { %1610 = vmatpush3.bf16.xpose.msra.mxu0 %v998_v35  ;;  %1611 = vmatprep.mubr.msk.bf16.mxu0 %vm1750_vm0, %v1749_v0 }
 0x210   :  { %1621 = vmatprep.subr.bf16.mxu0 %v1749_v0 }
 0x211   :  { %1606 = vmatmul.mubr.msk.bf16.vlgmr.msra.gmra.mrb[4].mxu1 %vm855_vm2, %v357_v36 }
 0x212   :  { %1617 = vmatprep.mubr.msk.bf16.mxu1 %vm1750_vm0, %v1749_v0 }
 0x216   :  { %1612 = vmatmul.mubr.msk.bf16.vlgmr.msra.gmra.mrb[8].mxu0 %vm855_vm2, %v358_v38 }
 0x217   :  { %1623 = vmatprep.mubr.msk.bf16.mxu0 %vm1750_vm0, %v1749_v0 }
 0x2dc   :  { %v896_v39 = vpop.f32.mrb[0].mxu1 }
 0x2dd   :  { %v1595_v40 = vpop.f32.mrb[1].mxu1  ;;  %v1041_v41 = vsel %vm1040_vm3, %v896_v39, -inf }
 0x2de   :  { %1042 = vmax.xlane.f32.xlu0 %v1041_v41  ;;  %v899_v42 = vpop.f32.mrb[2].mxu1 }
 0x2df   :  { %v1596_v43 = vpop.f32.mrb[3].mxu1 }
 0x2e1   :  { %v942_v44 = vpop.f32.mrb[4].mxu0 }
 0x2e2   :  { %v1601_v45 = vpop.f32.mrb[5].mxu0  ;;  %v1044_v46 = vsel %vm1040_vm3, %v942_v44, -inf }
 0x2e3   :  { %1045 = vmax.xlane.f32.xlu1 %v1044_v46  ;;  %v945_v47 = vpop.f32.mrb[6].mxu0 }
 0x2e4   :  { %v1602_v48 = vpop.f32.mrb[7].mxu0  ;;  %v988_v49 = vpop.f32.mrb[4].mxu1 }
 0x2e5   :  { %v1607_v50 = vpop.f32.mrb[5].mxu1  ;;  %v1047_v51 = vsel %vm1040_vm3, %v988_v49, -inf }
 0x2e6   :  { %1048 = vmax.xlane.f32.xlu0 %v1047_v51  ;;  %v991_v52 = vpop.f32.mrb[6].mxu1 }
 0x2e7   :  { %v1608_v53 = vpop.f32.mrb[7].mxu1 }
 0x2e9   :  { %v1034_v54 = vpop.f32.mrb[8].mxu0 }
 0x2ea   :  { %v1613_v55 = vpop.f32.mrb[9].mxu0  ;;  %v1050_v56 = vsel %vm1040_vm3, %v1034_v54, -inf }
 0x2eb   :  { %1051 = vmax.xlane.f32.xlu0 %v1050_v56  ;;  %v1037_v57 = vpop.f32.mrb[10].mxu0 }
 0x2ec   :  { %v1614_v58 = vpop.f32.mrb[11].mxu0 }
 0x2f4   :  { %607 = vrot.lane.b32.xlu1 %v1820_v8, %s1747_s0 }
 0x36b   :  { %v1043_v59 = vpop.xlane.xlu0 %1042 }
 0x36c   :  { %v1053_v61 = vsub.f32 %v896_v39, %v1043_v59 }
 0x36e   :  { %v1057_v60 = vmul.f32 1.442695, %v1053_v61 }
 0x370   :  { %1655 = vpow2.f32 %v1057_v60  ;;  %v1046_v62 = vpop.xlane.xlu1 %1045 }
 0x371   :  { %v1054_v63 = vsub.f32 %v942_v44, %v1046_v62 }
 0x373   :  { %v1059_v2 = vmul.f32 1.442695, %v1054_v63  ;;  %v1049_v8 = vpop.xlane.xlu0 %1048 }
 0x374   :  { %v1055_v10 = vsub.f32 %v988_v49, %v1049_v8 }
 0x375   :  { %1657 = vpow2.f32 %v1059_v2 }
 0x376   :  { %v1061_v15 = vmul.f32 1.442695, %v1055_v10 }
 0x378   :  { %v1052_v7 = vpop.xlane.xlu0 %1051 }
 0x379   :  { %v1056_v9 = vsub.f32 %v1034_v54, %v1052_v7 }
 0x37a   :  { %v1947_v3 = vpop.eup %1655 }
 0x37b   :  { %v1065_v4 = vsel %vm1040_vm3, %v1947_v3, 0.0  ;;  %v1063_v11 = vmul.f32 1.442695, %v1056_v9 }
 0x37c   :  { %1066 = vadd.xlane.f32.xlu1 %v1065_v4 }
 0x37d   :  { %1659 = vpow2.f32 %v1063_v11 }
 0x37e   :  { %1661 = vpow2.f32 %v1061_v15 }
 0x37f   :  { %v1951_v5 = vpop.eup %1657 }
 0x380   :  { %v1068_v6 = vsel %vm1040_vm3, %v1951_v5, 0.0 }
 0x381   :  { %1069 = vadd.xlane.f32.xlu0 %v1068_v6 }
 0x387   :  { %v1961_v16 = vpop.eup %1659 }
 0x388   :  { %v1963_v17 = vpop.eup %1661 }
 0x38d   :  { %611 = vrot.lane.b32.xlu1 %v1828_v13, %s1747_s0  ;;  %v1074_v13 = vsel %vm1040_vm3, %v1961_v16, 0.0 }
 0x391   :  { %613 = vrot.lane.b32.xlu1 %v1831_v14, %s1747_s0  ;;  %v1071_v14 = vsel %vm1040_vm3, %v1963_v17, 0.0 }
 0x397   :  { %609 = vrot.lane.b32.xlu0 %v1824_v12, %s1747_s0  ;;  %v608_v12 = vpop.permute.xlu1 %607 }
 0x398   :  { %v619_v1 = vcombine.high %v608_v12, %v1749_v0  ;;  %v626_v20 = vrot.slane %v608_v12, %v1834_v22 }
 0x39a   :  { %v633_v25 = vrot.slane %v619_v1, %v1834_v22 }
 0x3b5   :  { %1075 = vadd.xlane.f32.xlu1 %v1074_v13 }
 0x3b6   :  { %1072 = vadd.xlane.f32.xlu0 %v1071_v14 }
 0x409   :  { %v1067_v18 = vpop.xlane.xlu1 %1066 }
 0x40a   :  { %1663 = vrcp.f32 %v1067_v18 }
 0x40d   :  { %v612_v19 = vpop.permute.xlu1 %611 }
 0x40e   :  { %v634_v21 = vcombine.high %v612_v19, %v1749_v0  ;;  %v641_v23 = vrot.slane %v612_v19, %v1834_v22  ;;  %v1070_v24 = vpop.xlane.xlu0 %1069 }
 0x40f   :  { %1665 = vrcp.f32 %v1070_v24 }
 0x410   :  { %v648_v26 = vrot.slane %v634_v21, %v1834_v22  ;;  %v649_v27 = vcombine.low %v626_v20, %v641_v23  ;;  %v650_v28 = vcombine.high %v626_v20, %v641_v23 }
 0x411   :  { %v614_v29 = vpop.permute.xlu1 %613 }
 0x412   :  { %v657_v31 = vrot.slane %v649_v27, %v1845_v30  ;;  %v664_v32 = vrot.slane %v650_v28, %v1845_v30  ;;  %v665_v33 = vcombine.low %v633_v25, %v648_v26  ;;  %v666_v34 = vcombine.high %v633_v25, %v648_v26  ;;  %v610_v35 = vpop.permute.xlu0 %609 }
 0x413   :  { %v700_v36 = vcombine.high %v614_v29, %v1749_v0  ;;  %v707_v37 = vrot.slane %v614_v29, %v1834_v22  ;;  %v685_v38 = vcombine.high %v610_v35, %v1749_v0  ;;  %v692_v39 = vrot.slane %v610_v35, %v1834_v22 }
 0x414   :  { %v673_v40 = vrot.slane %v665_v33, %v1845_v30  ;;  %v680_v41 = vrot.slane %v666_v34, %v1845_v30  ;;  %v751_v42 = vcombine.low %v657_v31, %v664_v32  ;;  %v1548_v43 = vcombine.high %v657_v31, %v664_v32  ;;  %v1664_v62 = vpop.eup %1663 }
 0x415   :  { %v714_v44 = vrot.slane %v700_v36, %v1834_v22  ;;  %v699_v45 = vrot.slane %v685_v38, %v1834_v22  ;;  %v715_v46 = vcombine.low %v692_v39, %v707_v37  ;;  %v716_v51 = vcombine.high %v692_v39, %v707_v37 }
 0x416   :  { %v758_v47 = vrot.slane %v751_v42, %v1834_v22  ;;  %v766_v48 = vrot.slane %v1548_v43, %v1834_v22  ;;  %v767_v49 = vcombine.low %v673_v40, %v680_v41  ;;  %v1549_v50 = vcombine.high %v673_v40, %v680_v41 }
 0x417   :  { %v723_v52 = vrot.slane %v715_v46, %v1845_v30  ;;  %v731_v53 = vcombine.low %v699_v45, %v714_v44  ;;  %v732_v54 = vcombine.high %v699_v45, %v714_v44  ;;  %v730_v58 = vrot.slane %v716_v51, %v1845_v30 }
 0x418   :  { %v774_v55 = vrot.slane %v767_v49, %v1834_v22  ;;  %v782_v56 = vrot.slane %v1549_v50, %v1834_v22  ;;  %v783_v57 = vcombine.low %v758_v47, %v766_v48  ;;  %v1081_v1 = vmul.f32 %v1664_v62, %v1947_v3 }
 0x419   :  { %v739_v59 = vrot.slane %v731_v53, %v1845_v30  ;;  %v746_v61 = vrot.slane %v732_v54, %v1845_v30  ;;  %v801_v63 = vcombine.low %v723_v52, %v730_v58  ;;  %v1550_v2 = vcombine.high %v723_v52, %v730_v58  ;;  %v1666_v23 = vpop.eup %1665 }
 0x41a   :  { %v791_v60 = vcombine.low %v774_v55, %v782_v56  ;;  %v790_v8 = vrot.slane %v783_v57, %v1845_v30  ;;  %v1085_v28 = vpack.c.bf16 %v1081_v1, %v1081_v1  ;;  %v1082_v29 = vmul.f32 %v1666_v23, %v1951_v5 }
 0x41b   :  { %v817_v4 = vcombine.low %v739_v59, %v746_v61  ;;  %v1551_v6 = vcombine.high %v739_v59, %v746_v61  ;;  %v808_v9 = vrot.slane %v801_v63, %v1834_v22  ;;  %v816_v10 = vrot.slane %v1550_v2, %v1834_v22 }
 0x41c   :  { %v798_v7 = vrot.slane %v791_v60, %v1845_v30  ;;  %v1086_v34 = vpack.c.bf16 %v1082_v29, %v1082_v29 }
 0x41d   :  { %v824_v11 = vrot.slane %v817_v4, %v1834_v22  ;;  %v832_v15 = vrot.slane %v1551_v6, %v1834_v22  ;;  %v833_v12 = vcombine.low %v808_v9, %v816_v10 }
 0x41e   :  { %v799_v13 = vcombine.low %v790_v8, %v798_v7  ;;  %v800_v14 = vcombine.high %v790_v8, %v798_v7 }
 0x41f   :  { %v841_v18 = vcombine.low %v824_v11, %v832_v15  ;;  %v840_v20 = vrot.slane %v833_v12, %v1845_v30 }
 0x420   :  { %v851_v19 = vpack.c.bf16 %v799_v13, %v799_v13  ;;  %v853_v25 = vpack.c.bf16 %v800_v14, %v800_v14 }
 0x421   :  { %v848_v21 = vrot.slane %v841_v18, %v1845_v30 }
 0x422   :  { %v1094_v24 = vsel %vm1092_vm4, %v851_v19, 0  ;;  %v1186_v3 = vsel %vm1092_vm4, %v853_v25, 0 }
 0x423   :  { %1616 = vmatpush3.bf16.msra.mxu1 %v1094_v24  ;;  %v849_v26 = vcombine.low %v840_v20, %v848_v21  ;;  %v850_v27 = vcombine.high %v840_v20, %v848_v21 }
 0x424   :  { %1627 = vmatprep.subr.bf16.mxu1 %v1749_v0 }
 0x425   :  { %v852_v31 = vpack.c.bf16 %v849_v26, %v849_v26  ;;  %v854_v33 = vpack.c.bf16 %v850_v27, %v850_v27 }
 0x426   :  { %1618 = vmatmul.mubr.msk.bf16.vlgmr.msra.gmra.mrb[8].mxu1 %vm1040_vm3, %v1085_v28 }
 0x427   :  { %v1140_v32 = vsel %vm1092_vm4, %v852_v31, 0  ;;  %1628 = vmatpush3.bf16.msra.mxu1 %v1186_v3  ;;  %1629 = vmatprep.mubr.msk.bf16.mxu1 %vm1750_vm0, %v1749_v0  ;;  %v1232_v5 = vsel %vm1092_vm4, %v854_v33, 0 }
 0x428   :  { %1622 = vmatpush3.bf16.msra.mxu0 %v1140_v32 }
 0x429   :  { %1633 = vmatprep.subr.bf16.mxu0 %v1749_v0 }
 0x42b   :  { %1624 = vmatmul.mubr.msk.bf16.vlgmr.msra.gmra.mrb[12].mxu0 %vm1040_vm3, %v1086_v34 }
 0x42c   :  { %1634 = vmatpush3.bf16.msra.mxu0 %v1232_v5  ;;  %1635 = vmatprep.mubr.msk.bf16.mxu0 %vm1750_vm0, %v1749_v0 }
 0x442   :  { %v1076_v35 = vpop.xlane.xlu1 %1075 }
 0x443   :  { %1667 = vrcp.f32 %v1076_v35  ;;  %v1073_v36 = vpop.xlane.xlu0 %1072 }
 0x444   :  { %1669 = vrcp.f32 %v1073_v36 }
 0x44d   :  { %v1668_v37 = vpop.eup %1667 }
 0x44e   :  { %v1670_v38 = vpop.eup %1669  ;;  %v1084_v39 = vmul.f32 %v1668_v37, %v1961_v16 }
 0x44f   :  { %v1083_v40 = vmul.f32 %v1670_v38, %v1963_v17 }
 0x450   :  { %v1088_v41 = vpack.c.bf16 %v1084_v39, %v1084_v39 }
 0x451   :  { %v1087_v42 = vpack.c.bf16 %v1083_v40, %v1083_v40 }
 0x452   :  { %1636 = vmatmul.mubr.msk.bf16.vlgmr.msra.gmra.mrb[16].mxu0 %vm1040_vm3, %v1088_v41 }
 0x453   :  { %1630 = vmatmul.mubr.msk.bf16.vlgmr.msra.gmra.mrb[12].mxu1 %vm1040_vm3, %v1087_v42 }
 0x4f9   :  { %v1130_v43 = vpop.f32.mrb[8].mxu1 }
 0x4fa   :  { %v1619_v44 = vpop.f32.mrb[9].mxu1  ;;  %v1274_v16 = vcombine.high %v1130_v43, %v1749_v0  ;;  %v1281_v57 = vrot.slane %v1130_v43, %v1834_v22 }
 0x4fb   :  { %v1133_v45 = vpop.f32.mrb[10].mxu1 }
 0x4fc   :  { %v1620_v46 = vpop.f32.mrb[11].mxu1  ;;  %v1288_v7 = vrot.slane %v1274_v16, %v1834_v22 }
 0x4fe   :  { %v1176_v47 = vpop.f32.mrb[12].mxu0 }
 0x4ff   :  { %v1625_v48 = vpop.f32.mrb[13].mxu0  ;;  %v1340_v51 = vcombine.high %v1176_v47, %v1749_v0  ;;  %v1347_v17 = vrot.slane %v1176_v47, %v1834_v22 }
 0x500   :  { %v1179_v49 = vpop.f32.mrb[14].mxu0 }
 0x501   :  { %v1626_v50 = vpop.f32.mrb[15].mxu0  ;;  %v1354_v62 = vrot.slane %v1340_v51, %v1834_v22 }
 0x525   :  { %v1268_v52 = vpop.f32.mrb[16].mxu0 }
 0x526   :  { %v1222_v53 = vpop.f32.mrb[12].mxu1  ;;  %v1355_v54 = vcombine.high %v1268_v52, %v1749_v0  ;;  %v1362_v55 = vrot.slane %v1268_v52, %v1834_v22  ;;  %v1637_v56 = vpop.f32.mrb[17].mxu0 }
 0x527   :  { %v1289_v58 = vcombine.high %v1222_v53, %v1749_v0  ;;  %v1296_v59 = vrot.slane %v1222_v53, %v1834_v22  ;;  %v1631_v61 = vpop.f32.mrb[13].mxu1  ;;  %v1271_v60 = vpop.f32.mrb[18].mxu0 }
 0x528   :  { %v1369_v63 = vrot.slane %v1355_v54, %v1834_v22  ;;  %v1370_v2 = vcombine.low %v1347_v17, %v1362_v55  ;;  %v1371_v4 = vcombine.high %v1347_v17, %v1362_v55  ;;  %v1225_v6 = vpop.f32.mrb[14].mxu1  ;;  %v1638_v8 = vpop.f32.mrb[19].mxu0 }
 0x529   :  { %v1303_v9 = vrot.slane %v1289_v58, %v1834_v22  ;;  %v1304_v10 = vcombine.low %v1281_v57, %v1296_v59  ;;  %v1305_v11 = vcombine.high %v1281_v57, %v1296_v59  ;;  %v1632_v15 = vpop.f32.mrb[15].mxu1 }
 0x52a   :  { %v1378_v0 = vrot.slane %v1370_v2, %v1845_v30  ;;  %v1385_v13 = vrot.slane %v1371_v4, %v1845_v30  ;;  %v1386_v14 = vcombine.low %v1354_v62, %v1369_v63  ;;  %v1387_v12 = vcombine.high %v1354_v62, %v1369_v63 }
 0x52b   :  { %v1312_v18 = vrot.slane %v1304_v10, %v1845_v30  ;;  %v1319_v1 = vrot.slane %v1305_v11, %v1845_v30  ;;  %v1320_v19 = vcombine.low %v1288_v7, %v1303_v9  ;;  %v1321_v20 = vcombine.high %v1288_v7, %v1303_v9 }
 0x52c   :  { %v1394_v21 = vrot.slane %v1386_v14, %v1845_v30  ;;  %v1401_v23 = vrot.slane %v1387_v12, %v1845_v30  ;;  %v1456_v24 = vcombine.low %v1378_v0, %v1385_v13  ;;  %v1562_v25 = vcombine.high %v1378_v0, %v1385_v13 }
 0x52d   :  { %v1328_v26 = vrot.slane %v1320_v19, %v1845_v30  ;;  %v1335_v27 = vrot.slane %v1321_v20, %v1845_v30  ;;  %v1406_v28 = vcombine.low %v1312_v18, %v1319_v1  ;;  %v1560_v29 = vcombine.high %v1312_v18, %v1319_v1 }
 0x52e   :  { %v1463_v31 = vrot.slane %v1456_v24, %v1834_v22  ;;  %v1471_v3 = vrot.slane %v1562_v25, %v1834_v22  ;;  %v1472_v32 = vcombine.low %v1394_v21, %v1401_v23  ;;  %v1563_v33 = vcombine.high %v1394_v21, %v1401_v23 }
 0x52f   :  { %v1413_v34 = vrot.slane %v1406_v28, %v1834_v22  ;;  %v1421_v5 = vrot.slane %v1560_v29, %v1834_v22  ;;  %v1422_v35 = vcombine.low %v1328_v26, %v1335_v27  ;;  %v1561_v36 = vcombine.high %v1328_v26, %v1335_v27 }
 0x530   :  { %v1479_v37 = vrot.slane %v1472_v32, %v1834_v22  ;;  %v1487_v38 = vrot.slane %v1563_v33, %v1834_v22  ;;  %v1488_v39 = vcombine.low %v1463_v31, %v1471_v3 }
 0x531   :  { %v1429_v40 = vrot.slane %v1422_v35, %v1834_v22  ;;  %v1437_v41 = vrot.slane %v1561_v36, %v1834_v22  ;;  %v1438_v42 = vcombine.low %v1413_v34, %v1421_v5 }
 0x532   :  { %v1496_v43 = vcombine.low %v1479_v37, %v1487_v38  ;;  %v1495_v45 = vrot.slane %v1488_v39, %v1845_v30 }
 0x533   :  { %v1446_v44 = vcombine.low %v1429_v40, %v1437_v41  ;;  %v1445_v47 = vrot.slane %v1438_v42, %v1845_v30 }
 0x534   :  { %v1503_v46 = vrot.slane %v1496_v43, %v1845_v30 }
 0x535   :  { %v1453_v48 = vrot.slane %v1446_v44, %v1845_v30 }
 0x536   :  { %v1505_v49 = vcombine.high %v1495_v45, %v1503_v46  ;;  %v1504_v50 = vcombine.low %v1495_v45, %v1503_v46 }
 0x537   :  { %v1455_v51 = vcombine.high %v1445_v47, %v1453_v48  ;;  %v1454_v16 = vcombine.low %v1445_v47, %v1453_v48 }
 0x538   :  { %1510 = vrot.lane.b32.xlu1 %v1505_v49, %s1755_s2 }
 0x539   :  { %1508 = vrot.lane.b32.xlu0 %v1455_v51, %s1755_s2 }
 0x5aa   :  { %v1511_v22 = vpop.permute.xlu1 %1510 }
 0x5ab   :  { %v1509_v52 = vpop.permute.xlu0 %1508  ;;  %v1515_v17 = vsel %vm855_vm2, %v1504_v50, %v1511_v22 }
 0x5ac   :  { %v1514_v53 = vsel %vm855_vm2, %v1454_v16, %v1509_v52  ;;  %1517 = vst.msk [vmem:[#allocation7 + $0x8] sm:$0xff] %vm70_vm1, %v1515_v17 }
 0x5ad   :  { %1516 = vst.msk [vmem:[#allocation7] sm:$0xff] %vm70_vm1, %v1514_v53 }
 0x5ae   :  { %1726 = shalt.err (!%p1723_p6)
}
 0x5af   :  { %s1727_s20 = scalar_lea.hbm %s2073_s3, 256 }
 0x5b0   :  { %p1728_p7 = scmp.ne.s32.totalorder %s2073_s3, %s1727_s20  ;;  %p1731_p8 = scmp.lt.u32.totalorder %s1727_s20, %s2073_s3 }
 0x5b2   :  { %p1733_p9 = pnand %p1731_p8, %p1728_p7 }
 0x5b4   :  { %1736 = shalt.err (!%p1733_p9)
}
 0x5b5   :  { %1529 = dma.vmem_to_hbm [thread:$0]  %s1524_s16, 256, %s2073_s3, [#allocation4], %s1744_s22, %s1744_s22, %s1745_s23  }
 0x5b6   :  { %1741 = dma.done.wait [#allocation4], 256  }
 0x5b7   :  { %1742 = vsyncadd [#allocation4], 4294967040 }
 0x5b8   :  { %1533 = vsyncpa [#allocation3], 1 }
 0x5b9   :  { %1534 = vsyncpa [#allocation6], 1 }
 0x5ba   :  { %1535 = vsyncpa [#allocation4], 1 }

</bundles_post_ra>
